<compile_context>
chip_gen: v7x
topology: tpu7x:2x2x1
jax: 0.10.0
libtpu: 0.0.40
codegen_flags: <defaults>
</compile_context>

<pallas_src>
from functools import partial
from typing import NamedTuple

import jax
import jax.numpy as jnp
from jax.experimental import pallas as pl
from jax.experimental.pallas import tpu as pltpu


def _round_up(a, m):
    return -(-a // m) * m


# --------------------------------------------------------------------------- config


def _tpu_config():
    """Detect TPU generation / VMEM capacity; conservative fallbacks if queries fail."""
    kind = ""
    try:
        kind = jax.devices()[0].device_kind.lower()
    except Exception:
        pass
    vmem_capacity = None
    try:
        vmem_capacity = int(pltpu.get_tpu_info().vmem_capacity_bytes)
    except Exception:
        vmem_capacity = None
    is_v7 = "v7" in kind
    if vmem_capacity is None or vmem_capacity <= 0:
        # v7x has 64 MiB / TC; v4/v5e/v6e have 128 MiB.  Unknown -> conservative 64 MiB.
        vmem_capacity = (64 if (is_v7 or not kind) else 128) * 1024 * 1024
    vmem_capacity = min(vmem_capacity, 128 * 1024 * 1024)
    return dict(
        kind=kind,
        vmem_budget=vmem_capacity // 2,          # tiles (incl. double buffering)
        vmem_limit=(vmem_capacity * 3) // 4,     # scoped VMEM limit for Mosaic
        single_buffer_w=is_v7,                   # weight tile resident across batch loop
        two_cores=is_v7,                         # ensure >=2 parallel tiles for megacore
        bf16_vpu=("v6" in kind) or ("v7" in kind),
    )


class _LC2DMeta(NamedTuple):
    CO: int
    CI: int
    OH: int
    OW: int
    K: int
    R: int
    L: int
    R_pad: int
    L_pad: int
    CO_pad: int
    TCO: int
    TL: int
    f32_math: bool
    single_buffer_w: bool
    vmem_limit: int
    out_dtype: str


# --------------------------------------------------------------------------- kernel


def _lc2d_kernel(x_ref, w_ref, b_ref, o_ref, *, f32_math):
    # x_ref: (R_pad, TL)        unfolded patches, one batch element, one L tile
    # w_ref: (TCO, R_pad, TL)   per-location weights (resident across the batch loop)
    # b_ref: (TCO, TL)          per-location bias
    # o_ref: (TCO, TL)
    tco, tl = o_ref.shape
    r_pad = x_ref.shape[0]

    # Small lane / sublane chunks keep live vreg ranges bounded (no hoisted x tile).
    lc = 128 if tco > 8 else (256 if tl % 256 == 0 else 128)
    rc_step = 64 if r_pad > 64 else r_pad

    for c0 in range(0, tl, lc):                                 # static, small trip count
        bias = b_ref[:, pl.ds(c0, lc)].astype(jnp.float32)      # one full-block bias load
        rows = []
        for co in range(tco):                                   # bounded static unroll
            acc = None
            for r0 in range(0, r_pad, rc_step):                 # sublane chunks
                rc = min(rc_step, r_pad - r0)
                xs = x_ref[pl.ds(r0, rc), pl.ds(c0, lc)]
                ws = w_ref[co, pl.ds(r0, rc), pl.ds(c0, lc)]
                if f32_math:
                    xs = xs.astype(jnp.float32)
                    ws = ws.astype(jnp.float32)
                # bf16 multiply (v6e/v7x) or f32 multiply; accumulation always f32.
                part = jnp.sum(xs * ws, axis=0, keepdims=True, dtype=jnp.float32)
                acc = part if acc is None else acc + part
            rows.append(acc)                                    # (1, lc) f32 row
        block = jnp.concatenate(rows, axis=0) + bias            # (tco, lc) f32
        # Single unmasked, lane-aligned store for the whole co block.
        o_ref[:, pl.ds(c0, lc)] = block.astype(o_ref.dtype)


# --------------------------------------------------------------------------- tiling


def _pick_tiles(CO, R_pad, L, itemsize, out_itemsize, *, vmem_budget_bytes,
                vmem_limit_bytes, w_buffers=2, max_tl=1024, want_multi_tile=False):
    """Pick (TCO, TL, CO_pad, L_pad).  TL is a multiple of 128; L is padded up to TL."""
    L128 = _round_up(L, 128)
    CO_pad = _round_up(CO, 8)
    tl_cands = list(range(min(max_tl, L128), 127, -128))        # descending multiples of 128
    tco_cands = [t for t in (16, 8) if CO_pad % t == 0]         # always contains 8

    margin = 4 * 1024 * 1024

    def footprint(tco, tl, wb):
        w_t = wb * tco * R_pad * tl * itemsize
        x_t = 2 * R_pad * tl * itemsize
        b_t = 2 * tco * tl * itemsize
        o_t = 2 * tco * tl * out_itemsize
        return w_t + x_t + b_t + o_t

    def fits(tco, tl):
        # Must fit the budget with the intended weight buffering, AND fit the hard
        # vmem limit even if single-buffering is unavailable (fallback path).
        return (footprint(tco, tl, w_buffers) <= vmem_budget_bytes
                and footprint(tco, tl, 2) + margin <= vmem_limit_bytes)

    best = None
    for tl in tl_cands:
        for tco in tco_cands:
            if not fits(tco, tl):
                continue
            l_pad = _round_up(L, tl)
            waste_ok = (l_pad - L128) * 8 <= L128               # <=12.5% extra lanes
            key = (waste_ok, min(tl, 512), tco, tl)
            if best is None or key > best[0]:
                best = (key, tco, tl)
    if best is None:
        raise ValueError(
            "LocallyConnected2d: no (TCO, TL) tile fits the VMEM budget "
            f"({vmem_budget_bytes} B) for R_pad={R_pad}; reduce channels/kernel size "
            "or raise the budget.")
    _, TCO, TL = best
    L_pad = _round_up(L, TL)

    # v7x megacore: make sure the parallel grid axes have >= 2 tiles.
    if want_multi_tile and (CO_pad // TCO) * (L_pad // TL) < 2 and L128 >= 256:
        TL = max(128, _round_up(L128 // 2, 128))
        L_pad = _round_up(L, TL)

    return TCO, TL, CO_pad, L_pad


# --------------------------------------------------------------------------- params


def prepare_lc2d_params(weight, bias, compute_dtype=None, out_dtype=jnp.float32):
    """One-time layout of module parameters into kernel-facing slabs.

    weight: (1, C_out, C_in, OH, OW, K)   K = kernel_size**2
    bias:   (1, C_out, OH, OW)
    Do this once at parameter-init time, NOT per forward call.
    compute_dtype=jnp.bfloat16 halves the dominant weight HBM stream.
    """
    _, CO, CI, OH, OW, K = weight.shape
    R, L = CI * K, OH * OW
    cfg = _tpu_config()

    dtype = jnp.dtype(compute_dtype) if compute_dtype is not None else jnp.dtype(weight.dtype)
    itemsize = dtype.itemsize
    R_pad = _round_up(R, 8)
    w_buffers = 1 if cfg["single_buffer_w"] else 2

    TCO, TL, CO_pad, L_pad = _pick_tiles(
        CO, R_pad, L, itemsize, jnp.dtype(out_dtype).itemsize,
        vmem_budget_bytes=cfg["vmem_budget"], vmem_limit_bytes=cfg["vmem_limit"],
        w_buffers=w_buffers, want_multi_tile=cfg["two_cores"])

    # (CO, CI, OH, OW, K) -> (CO, CI, K, OH, OW) -> (CO, R, L); zero-pad to tile grid.
    w = weight[0].transpose(0, 1, 4, 2, 3).reshape(CO, R, L).astype(dtype)
    w = jnp.pad(w, ((0, CO_pad - CO), (0, R_pad - R), (0, L_pad - L)))
    b = bias[0].reshape(CO, L).astype(dtype)
    b = jnp.pad(b, ((0, CO_pad - CO), (0, L_pad - L)))

    # bf16 multiply only where the VPU supports it (v6e/v7x); v5e upcasts at load.
    f32_math = not (dtype == jnp.dtype(jnp.bfloat16) and cfg["bf16_vpu"])

    meta = _LC2DMeta(CO=CO, CI=CI, OH=OH, OW=OW, K=K, R=R, L=L,
                     R_pad=R_pad, L_pad=L_pad, CO_pad=CO_pad, TCO=TCO, TL=TL,
                     f32_math=f32_math, single_buffer_w=cfg["single_buffer_w"],
                     vmem_limit=int(cfg["vmem_limit"]),
                     out_dtype=jnp.dtype(out_dtype).name)
    return dict(w=w, b=b, meta=meta)


# --------------------------------------------------------------------------- forward


@partial(jax.jit, static_argnames=("meta", "kernel_size", "stride", "padding"))
def _lc2d_forward(x, w, b, *, meta, kernel_size, stride, padding):
    N, C, H, W = x.shape
    CO, CI, OH, OW, K = meta.CO, meta.CI, meta.OH, meta.OW, meta.K
    R, L, R_pad, L_pad = meta.R, meta.L, meta.R_pad, meta.L_pad
    CO_pad, TCO, TL = meta.CO_pad, meta.TCO, meta.TL
    out_dtype = jnp.dtype(meta.out_dtype)
    assert CI == C and K == kernel_size * kernel_size

    kh = kw = kernel_size
    dh = dw = stride
    p = padding

    # ---- glue: pad + unfold (identical to F.pad + Tensor.unfold), fused under jit ----
    # TODO(synk): move the unfold in-kernel (DMA a padded (C, strip, W+2p) block per
    # l-tile and build the K shifted views with pl.ds) to cut input HBM bytes K-fold.
    xp = jnp.pad(x, ((0, 0), (0, 0), (p, p), (p, p)))
    oh_idx = jnp.arange(OH)[:, None] * dh + jnp.arange(kh)[None, :]   # (OH, kh)
    ow_idx = jnp.arange(OW)[:, None] * dw + jnp.arange(kw)[None, :]   # (OW, kw)
    patches = xp[:, :, oh_idx[:, None, :, None], ow_idx[None, :, None, :]]
    patches = patches.reshape(N, C, OH, OW, K)
    x_slab = patches.transpose(0, 1, 4, 2, 3).reshape(N, R, L).astype(w.dtype)
    x_slab = jnp.pad(x_slab, ((0, 0), (0, R_pad - R), (0, L_pad - L)))

    # v7x: weight tile is resident across the whole innermost batch loop -> one buffer.
    w_spec_kwargs = {}
    if meta.single_buffer_w:
        w_spec_kwargs["pipeline_mode"] = pl.Buffered(1)

    # Batch innermost -> each weight tile is DMA'd once per (co, l) tile and stays
    # resident in VMEM across the batch loop (the weight stream dominates HBM bytes).
    grid = (CO_pad // TCO, L_pad // TL, N)

    out = pl.pallas_call(
        partial(_lc2d_kernel, f32_math=meta.f32_math),
        out_shape=jax.ShapeDtypeStruct((N, CO_pad, L_pad), out_dtype),
        grid_spec=pltpu.PrefetchScalarGridSpec(
            num_scalar_prefetch=0,
            grid=grid,
            in_specs=[
                pl.BlockSpec((None, R_pad, TL), lambda co, l, n: (n, 0, l)),
                pl.BlockSpec((TCO, R_pad, TL), lambda co, l, n: (co, 0, l),
                             **w_spec_kwargs),                         # n-independent
                pl.BlockSpec((TCO, TL), lambda co, l, n: (co, l)),     # n-independent
            ],
            out_specs=pl.BlockSpec((None, TCO, TL), lambda co, l, n: (n, co, l)),
        ),
        compiler_params=pltpu.CompilerParams(
            dimension_semantics=("parallel", "parallel", "arbitrary"),
            vmem_limit_bytes=meta.vmem_limit,
        ),
    )(x_slab, w, b)

    return out[:, :CO, :L].reshape(N, CO, OH, OW)


def locally_connected_2d(x, params, kernel_size, stride, padding):
    """Forward pass matching the PyTorch LocallyConnected2d module.

    x: (N, C_in, H, W) NCHW. Returns (N, C_out, OH, OW).
    """
    meta = params["meta"]
    if meta.single_buffer_w:
        try:
            return _lc2d_forward(x, params["w"], params["b"], meta=meta,
                                 kernel_size=kernel_size, stride=stride, padding=padding)
        except Exception:
            # Fallback if single-buffered pipelining is unavailable on this runtime.
            meta = meta._replace(single_buffer_w=False)
    return _lc2d_forward(x, params["w"], params["b"], meta=meta,
                         kernel_size=kernel_size, stride=stride, padding=padding)


# --------------------------------------------------------------------------- demo


if __name__ == "__main__":
    # Small, self-consistent shapes:
    #   in_channels=4, out_channels=8, kernel_size=3, stride=1, padding=1
    #   input 16x16  ->  output_size = 16x16
    N, C_IN, H, W = 2, 4, 16, 16
    C_OUT, KS, STRIDE, PAD = 8, 3, 1, 1
    OH = (H + 2 * PAD - KS) // STRIDE + 1
    OW = (W + 2 * PAD - KS) // STRIDE + 1
    K = KS * KS

    key = jax.random.PRNGKey(0)
    kw_, kb_, kx_ = jax.random.split(key, 3)
    weight = jax.random.normal(kw_, (1, C_OUT, C_IN, OH, OW, K), dtype=jnp.float32)
    bias = jax.random.normal(kb_, (1, C_OUT, OH, OW), dtype=jnp.float32)
    x = jax.random.normal(kx_, (N, C_IN, H, W), dtype=jnp.float32)

    # f32 storage -> tight check against the f32 reference.
    params = prepare_lc2d_params(weight, bias)
    out = jax.block_until_ready(locally_connected_2d(x, params, KS, STRIDE, PAD))

    # Pure-JAX reference (mirrors the PyTorch forward exactly).
    xp = jnp.pad(x, ((0, 0), (0, 0), (PAD, PAD), (PAD, PAD)))
    oh_idx = jnp.arange(OH)[:, None] * STRIDE + jnp.arange(KS)[None, :]
    ow_idx = jnp.arange(OW)[:, None] * STRIDE + jnp.arange(KS)[None, :]
    patches = xp[:, :, oh_idx[:, None, :, None], ow_idx[None, :, None, :]]
    patches = patches.reshape(N, C_IN, OH, OW, K)
    ref = jnp.sum(patches[:, None] * weight, axis=(2, -1)) + bias

    assert out.shape == (N, C_OUT, OH, OW)
    assert jnp.allclose(out, ref, rtol=1e-5, atol=1e-5)

    # bf16 storage path (recommended default: halves the dominant HBM stream);
    # loose smoke check only -- storage/multiply rounding breaks 1e-5 tolerances.
    params_bf16 = prepare_lc2d_params(weight, bias, compute_dtype=jnp.bfloat16)
    out_bf16 = jax.block_until_ready(locally_connected_2d(x, params_bf16, KS, STRIDE, PAD))
    assert out_bf16.shape == ref.shape
    assert bool(jnp.isfinite(out_bf16).all())
    assert float(jnp.max(jnp.abs(out_bf16 - ref))) < 1.0

    print("KERNEL_OK")
</pallas_src>

<mosaic_0001>
module attributes {stable_mosaic.version = 11 : i64} {
  func.func @_lc2d_kernel(%arg0: i32, %arg1: i32, %arg2: i32, %arg3: memref<1x40x256xf32, #tpu.memory_space<vmem>>, %arg4: memref<8x40x256xf32, #tpu.memory_space<vmem>>, %arg5: memref<8x256xf32, #tpu.memory_space<vmem>>, %arg6: memref<1x8x256xf32, #tpu.memory_space<vmem>>) attributes {dimension_semantics = [#tpu.dimension_semantics<parallel>, #tpu.dimension_semantics<parallel>, #tpu.dimension_semantics<arbitrary>], iteration_bounds = array<i64: 1, 1, 2>, scalar_prefetch = 0 : i64, scratch_operands = 0 : i64, tpu.core_type = #tpu.core_type<tc>, window_params = [{transform_indices = @transform_0, window_bounds = array<i64: 1, 40, 256>}, {transform_indices = @transform_1, window_bounds = array<i64: 8, 40, 256>}, {transform_indices = @transform_2, window_bounds = array<i64: 8, 256>}, {transform_indices = @transform_3, window_bounds = array<i64: 1, 8, 256>}]} {
    %c0 = arith.constant 0 : index
    %c0_0 = arith.constant 0 : index
    %0 = vector.load %arg5[%c0, %c0_0] : memref<8x256xf32, #tpu.memory_space<vmem>>, vector<8x256xf32>
    %c0_1 = arith.constant 0 : index
    %c0_2 = arith.constant 0 : index
    %c0_3 = arith.constant 0 : index
    %1 = vector.load %arg3[%c0_1, %c0_2, %c0_3] : memref<1x40x256xf32, #tpu.memory_space<vmem>>, vector<1x40x256xf32>
    %2 = vector.shape_cast %1 : vector<1x40x256xf32> to vector<40x256xf32>
    %c0_4 = arith.constant 0 : index
    %c0_5 = arith.constant 0 : index
    %c0_6 = arith.constant 0 : index
    %3 = vector.load %arg4[%c0_4, %c0_5, %c0_6] : memref<8x40x256xf32, #tpu.memory_space<vmem>>, vector<1x40x256xf32>
    %4 = vector.shape_cast %3 : vector<1x40x256xf32> to vector<40x256xf32>
    %5 = arith.mulf %2, %4 : vector<40x256xf32>
    %cst = arith.constant dense<0.000000e+00> : vector<256xf32>
    %6 = vector.multi_reduction <add>, %5, %cst [0] : vector<40x256xf32> to vector<256xf32>
    %7 = vector.shape_cast %6 : vector<256xf32> to vector<1x256xf32>
    %c0_7 = arith.constant 0 : index
    %c0_8 = arith.constant 0 : index
    %c0_9 = arith.constant 0 : index
    %8 = vector.load %arg3[%c0_7, %c0_8, %c0_9] : memref<1x40x256xf32, #tpu.memory_space<vmem>>, vector<1x40x256xf32>
    %9 = vector.shape_cast %8 : vector<1x40x256xf32> to vector<40x256xf32>
    %c1 = arith.constant 1 : index
    %c0_10 = arith.constant 0 : index
    %c0_11 = arith.constant 0 : index
    %10 = vector.load %arg4[%c1, %c0_10, %c0_11] : memref<8x40x256xf32, #tpu.memory_space<vmem>>, vector<1x40x256xf32>
    %11 = vector.shape_cast %10 : vector<1x40x256xf32> to vector<40x256xf32>
    %12 = arith.mulf %9, %11 : vector<40x256xf32>
    %cst_12 = arith.constant dense<0.000000e+00> : vector<256xf32>
    %13 = vector.multi_reduction <add>, %12, %cst_12 [0] : vector<40x256xf32> to vector<256xf32>
    %14 = vector.shape_cast %13 : vector<256xf32> to vector<1x256xf32>
    %c0_13 = arith.constant 0 : index
    %c0_14 = arith.constant 0 : index
    %c0_15 = arith.constant 0 : index
    %15 = vector.load %arg3[%c0_13, %c0_14, %c0_15] : memref<1x40x256xf32, #tpu.memory_space<vmem>>, vector<1x40x256xf32>
    %16 = vector.shape_cast %15 : vector<1x40x256xf32> to vector<40x256xf32>
    %c2 = arith.constant 2 : index
    %c0_16 = arith.constant 0 : index
    %c0_17 = arith.constant 0 : index
    %17 = vector.load %arg4[%c2, %c0_16, %c0_17] : memref<8x40x256xf32, #tpu.memory_space<vmem>>, vector<1x40x256xf32>
    %18 = vector.shape_cast %17 : vector<1x40x256xf32> to vector<40x256xf32>
    %19 = arith.mulf %16, %18 : vector<40x256xf32>
    %cst_18 = arith.constant dense<0.000000e+00> : vector<256xf32>
    %20 = vector.multi_reduction <add>, %19, %cst_18 [0] : vector<40x256xf32> to vector<256xf32>
    %21 = vector.shape_cast %20 : vector<256xf32> to vector<1x256xf32>
    %c0_19 = arith.constant 0 : index
    %c0_20 = arith.constant 0 : index
    %c0_21 = arith.constant 0 : index
    %22 = vector.load %arg3[%c0_19, %c0_20, %c0_21] : memref<1x40x256xf32, #tpu.memory_space<vmem>>, vector<1x40x256xf32>
    %23 = vector.shape_cast %22 : vector<1x40x256xf32> to vector<40x256xf32>
    %c3 = arith.constant 3 : index
    %c0_22 = arith.constant 0 : index
    %c0_23 = arith.constant 0 : index
    %24 = vector.load %arg4[%c3, %c0_22, %c0_23] : memref<8x40x256xf32, #tpu.memory_space<vmem>>, vector<1x40x256xf32>
    %25 = vector.shape_cast %24 : vector<1x40x256xf32> to vector<40x256xf32>
    %26 = arith.mulf %23, %25 : vector<40x256xf32>
    %cst_24 = arith.constant dense<0.000000e+00> : vector<256xf32>
    %27 = vector.multi_reduction <add>, %26, %cst_24 [0] : vector<40x256xf32> to vector<256xf32>
    %28 = vector.shape_cast %27 : vector<256xf32> to vector<1x256xf32>
    %c0_25 = arith.constant 0 : index
    %c0_26 = arith.constant 0 : index
    %c0_27 = arith.constant 0 : index
    %29 = vector.load %arg3[%c0_25, %c0_26, %c0_27] : memref<1x40x256xf32, #tpu.memory_space<vmem>>, vector<1x40x256xf32>
    %30 = vector.shape_cast %29 : vector<1x40x256xf32> to vector<40x256xf32>
    %c4 = arith.constant 4 : index
    %c0_28 = arith.constant 0 : index
    %c0_29 = arith.constant 0 : index
    %31 = vector.load %arg4[%c4, %c0_28, %c0_29] : memref<8x40x256xf32, #tpu.memory_space<vmem>>, vector<1x40x256xf32>
    %32 = vector.shape_cast %31 : vector<1x40x256xf32> to vector<40x256xf32>
    %33 = arith.mulf %30, %32 : vector<40x256xf32>
    %cst_30 = arith.constant dense<0.000000e+00> : vector<256xf32>
    %34 = vector.multi_reduction <add>, %33, %cst_30 [0] : vector<40x256xf32> to vector<256xf32>
    %35 = vector.shape_cast %34 : vector<256xf32> to vector<1x256xf32>
    %c0_31 = arith.constant 0 : index
    %c0_32 = arith.constant 0 : index
    %c0_33 = arith.constant 0 : index
    %36 = vector.load %arg3[%c0_31, %c0_32, %c0_33] : memref<1x40x256xf32, #tpu.memory_space<vmem>>, vector<1x40x256xf32>
    %37 = vector.shape_cast %36 : vector<1x40x256xf32> to vector<40x256xf32>
    %c5 = arith.constant 5 : index
    %c0_34 = arith.constant 0 : index
    %c0_35 = arith.constant 0 : index
    %38 = vector.load %arg4[%c5, %c0_34, %c0_35] : memref<8x40x256xf32, #tpu.memory_space<vmem>>, vector<1x40x256xf32>
    %39 = vector.shape_cast %38 : vector<1x40x256xf32> to vector<40x256xf32>
    %40 = arith.mulf %37, %39 : vector<40x256xf32>
    %cst_36 = arith.constant dense<0.000000e+00> : vector<256xf32>
    %41 = vector.multi_reduction <add>, %40, %cst_36 [0] : vector<40x256xf32> to vector<256xf32>
    %42 = vector.shape_cast %41 : vector<256xf32> to vector<1x256xf32>
    %c0_37 = arith.constant 0 : index
    %c0_38 = arith.constant 0 : index
    %c0_39 = arith.constant 0 : index
    %43 = vector.load %arg3[%c0_37, %c0_38, %c0_39] : memref<1x40x256xf32, #tpu.memory_space<vmem>>, vector<1x40x256xf32>
    %44 = vector.shape_cast %43 : vector<1x40x256xf32> to vector<40x256xf32>
    %c6 = arith.constant 6 : index
    %c0_40 = arith.constant 0 : index
    %c0_41 = arith.constant 0 : index
    %45 = vector.load %arg4[%c6, %c0_40, %c0_41] : memref<8x40x256xf32, #tpu.memory_space<vmem>>, vector<1x40x256xf32>
    %46 = vector.shape_cast %45 : vector<1x40x256xf32> to vector<40x256xf32>
    %47 = arith.mulf %44, %46 : vector<40x256xf32>
    %cst_42 = arith.constant dense<0.000000e+00> : vector<256xf32>
    %48 = vector.multi_reduction <add>, %47, %cst_42 [0] : vector<40x256xf32> to vector<256xf32>
    %49 = vector.shape_cast %48 : vector<256xf32> to vector<1x256xf32>
    %c0_43 = arith.constant 0 : index
    %c0_44 = arith.constant 0 : index
    %c0_45 = arith.constant 0 : index
    %50 = vector.load %arg3[%c0_43, %c0_44, %c0_45] : memref<1x40x256xf32, #tpu.memory_space<vmem>>, vector<1x40x256xf32>
    %51 = vector.shape_cast %50 : vector<1x40x256xf32> to vector<40x256xf32>
    %c7 = arith.constant 7 : index
    %c0_46 = arith.constant 0 : index
    %c0_47 = arith.constant 0 : index
    %52 = vector.load %arg4[%c7, %c0_46, %c0_47] : memref<8x40x256xf32, #tpu.memory_space<vmem>>, vector<1x40x256xf32>
    %53 = vector.shape_cast %52 : vector<1x40x256xf32> to vector<40x256xf32>
    %54 = arith.mulf %51, %53 : vector<40x256xf32>
    %cst_48 = arith.constant dense<0.000000e+00> : vector<256xf32>
    %55 = vector.multi_reduction <add>, %54, %cst_48 [0] : vector<40x256xf32> to vector<256xf32>
    %56 = vector.shape_cast %55 : vector<256xf32> to vector<1x256xf32>
    %57 = tpu.concatenate %7, %14, %21, %28, %35, %42, %49, %56 in 0 : vector<1x256xf32>, vector<1x256xf32>, vector<1x256xf32>, vector<1x256xf32>, vector<1x256xf32>, vector<1x256xf32>, vector<1x256xf32>, vector<1x256xf32> -> vector<8x256xf32>
    %58 = arith.addf %57, %0 : vector<8x256xf32>
    %c0_49 = arith.constant 0 : index
    %c0_50 = arith.constant 0 : index
    %c0_51 = arith.constant 0 : index
    %59 = vector.load %arg6[%c0_49, %c0_50, %c0_51] : memref<1x8x256xf32, #tpu.memory_space<vmem>>, vector<1x8x256xf32>
    %60 = vector.shape_cast %59 : vector<1x8x256xf32> to vector<8x256xf32>
    %61 = vector.shape_cast %58 : vector<8x256xf32> to vector<1x8x256xf32>
    tpu.vector_store %arg6[%c0_49, %c0_50, %c0_51], %61 {strides = array<i32>} : memref<1x8x256xf32, #tpu.memory_space<vmem>>, vector<1x8x256xf32>,
    return
  }
  func.func @transform_0(%arg0: i32, %arg1: i32, %arg2: i32) -> (i32, i32, i32) {
    %c0_i32 = arith.constant 0 : i32
    %c0_i32_0 = arith.constant 0 : i32
    return %arg2, %c0_i32, %arg1 : i32, i32, i32
  }
  func.func @transform_1(%arg0: i32, %arg1: i32, %arg2: i32) -> (i32, i32, i32) {
    %c0_i32 = arith.constant 0 : i32
    %c0_i32_0 = arith.constant 0 : i32
    return %arg0, %c0_i32, %arg1 : i32, i32, i32
  }
  func.func @transform_2(%arg0: i32, %arg1: i32, %arg2: i32) -> (i32, i32) {
    %c0_i32 = arith.constant 0 : i32
    return %arg0, %arg1 : i32, i32
  }
  func.func @transform_3(%arg0: i32, %arg1: i32, %arg2: i32) -> (i32, i32, i32) {
    %c0_i32 = arith.constant 0 : i32
    return %arg2, %arg0, %arg1 : i32, i32, i32
  }
}

</mosaic_0001>

<bundles_post_ra>
// kernel: _lc2d_forward.1
= control target key start
LH: loop header
LB: loop body
LE: loop exit
PB: predicated region body
PF: predicated region fallthrough
CT: control target
= control target key end

     0   :  { %8 = vsyncpa [#allocation3], 0  ;;  %s1471_s0 = inlined_call_operand.hbm [shape: f32[2,40,256], index: 0, kind: input, shape index: {}]   ;;  %s1472_s1 = inlined_call_operand.hbm [shape: f32[8,40,256], index: 1, kind: input, shape index: {}]   ;;  %s1473_s2 = inlined_call_operand.hbm [shape: f32[8,256], index: 2, kind: input, shape index: {}]   ;;  %s1474_s3 = inlined_call_operand.hbm [shape: f32[2,8,256], index: 3, kind: output, shape index: {}]  }
   0x1   :  { %10 = vsyncpa [#allocation3 + $0x1], 0 }
   0x2   :  { %11 = vsyncpa [#allocation6], 0 }
   0x3   :  { %12 = vsyncpa [#allocation4], 0 }
   0x4   :  { %14 = vsyncpa [#allocation4 + $0x1], 0  ;;  %s1079_s12 = smov 0   ;;  %s1081_s13 = smov 0  }
   0x5   :  { %s1083_s14 = smov 0   ;;  %s1085_s15 = smov 0  }
   0x6   :  { %s1087_s16 = smov 0   ;;  %s1089_s17 = smov 0  }
   0x7 LB: > { %s774_s18 = sadd.s32 4294967295, %s1051_s17   ;;  %s775_s19 = sadd.s32 4294967294, %s1051_s17   ;;  %s1051_s17 = sphi %s1089_s17, %s20_s17   ;;  %s1047_s16 = sphi %s1087_s16, %s1496_s16   ;;  %s1043_s15 = sphi %s1085_s15, %s1495_s15   ;;  %s1039_s14 = sphi %s1083_s14, %s1494_s14   ;;  %s1035_s13 = sphi %s1081_s13, %s1493_s13   ;;  %s1031_s12 = sphi %s1079_s12, %s1492_s12  }
   0x8   : > { %p61_p0 = scmp.ne.s32.totalorder %s1035_s13, %s1031_s12  ;;  %p1113_p1 = scmp.eq.s32.totalorder %s774_s18, 0 }
   0x9   : > { %p1117_p2 = scmp.eq.s32.totalorder %s774_s18, 1  ;;  %p151_p3 = scmp.eq.s32.totalorder %s775_s19, 1 }
   0xa   : > { %s1479_s20 = scalar_select %p1113_p1, 1, 0 }
   0xb   : > { %p1123_p4 = por %p1113_p1, %p61_p0  ;;  %p776_p5 = scmp.ge.s32.totalorder %s1051_s17, 1 }
   0xc   : > { %p1128_p6 = por %p151_p3, %p61_p0  ;;  %p158_p7 = scmp.lt.s32.totalorder %s1051_s17, 3 }
   0xd   : > { %s1481_s22 = scalar_select %p1123_p4, 1, 0 }
   0xe   : > { %s1482_s23 = scalar_select %p1128_p6, 1, 0 }
   0xf   : > { %p1133_p8 = pnand %p776_p5, %p158_p7  ;;  %s1053_s25 = smov [#allocation5]  }
  0x10   : > { %s176_s26 = sshll.u32 %s1053_s25, 4  ;;  %s1054_s28 = smov [#allocation7]   ;;  %s1137_s26 = int_to_ptr.vmem [resolvable:$true] %s176_s26 }
  0x11   : > { %p806_p9 = pneg %p1133_p8  ;;  %s195_s29 = sshll.u32 %s1054_s28, 4  ;;  %s1148_s29 = int_to_ptr.vmem [resolvable:$true] %s195_s29 }
  0x12   : > { %s879_s5 = scalar_lea.hbm %s1472_s1, 10240 }
  0x13   : > { %p1144_p11 = pnand %p806_p9, %p1113_p1  ;;  %p880_p12 = scmp.ne.s32.totalorder %s1472_s1, %s879_s5 }
  0x14   : > { %p886_p5 = scmp.lt.u32.totalorder %s879_s5, %s1472_s1 }
  0x15   : > { %p881_p13 = pneg %p1144_p11 }
  0x17   : > { %p882_p0 = pnand %p881_p13, %p880_p12 }
  0x19   : > { %p883_p3 = pneg %p882_p0 }
  0x1b   : > { %p888_p7 = pnand %p886_p5, %p883_p3 }
  0x1d   : > { %891 = shalt.err (!%p888_p7)
}
  0x1e   : > { %s892_s10 = scalar_lea.vmem %s1137_s26, 10240  ;;  %p900_p1 = scmp.lt.s32.totalorder %s1137_s26, %s1137_s26 }
  0x1f   : > { %p893_p9 = scmp.ne.s32.totalorder %s1137_s26, %s892_s10  ;;  %p901_p12 = scmp.lt.s32.totalorder %s892_s10, %s892_s10 }
  0x21   : > { %p895_p10 = pnand %p893_p9, %p881_p13  ;;  %p902_p0 = por %p901_p12, %p900_p1 }
  0x23   : > { %p896_p6 = pneg %p895_p10 }
  0x25   : > { %p903_p4 = pnand %p902_p0, %p896_p6 }
  0x27   : > { %906 = shalt.err (!%p903_p4)
}
  0x28   : > { %s1055_s11 = smov 256   ;;  %s1056_s18 = smov 16  }
  0x29   : > { %809 = dma.hbm_to_vmem [thread:$0]  (!%p1144_p11), %s1472_s1, 10240, %s1137_s26, [#allocation6], %s1055_s11, %s1055_s11, %s1056_s18  }
  0x2a   : > { %s907_s4 = scalar_lea.hbm %s1473_s2, 256 }
  0x2b   : > { %p908_p1 = scmp.ne.s32.totalorder %s1473_s2, %s907_s4  ;;  %p914_p10 = scmp.lt.u32.totalorder %s907_s4, %s1473_s2 }
  0x2d   : > { %p910_p4 = pnand %p908_p1, %p881_p13 }
  0x2f   : > { %p911_p6 = pneg %p910_p4 }
  0x31   : > { %p916_p3 = pnand %p914_p10, %p911_p6 }
  0x33   : > { %919 = shalt.err (!%p916_p3)
}
  0x34   : > { %s920_s26 = scalar_lea.vmem %s1148_s29, 256  ;;  %p928_p12 = scmp.lt.s32.totalorder %s1148_s29, %s1148_s29 }
  0x35   : > { %p921_p5 = scmp.ne.s32.totalorder %s1148_s29, %s920_s26  ;;  %p929_p0 = scmp.lt.s32.totalorder %s920_s26, %s920_s26 }
  0x37   : > { %p923_p7 = pnand %p921_p5, %p881_p13  ;;  %p930_p1 = por %p929_p0, %p928_p12 }
  0x39   : > { %p924_p9 = pneg %p923_p7 }
  0x3b   : > { %p931_p4 = pnand %p930_p1, %p924_p9 }
  0x3d   : > { %934 = shalt.err (!%p931_p4)
}
  0x3e   : > { %812 = dma.hbm_to_vmem [thread:$0]  (!%p1144_p11), %s1473_s2, 256, %s1148_s29, [#allocation6]  }
  0x3f   : > { %s32_s19 = sadd.s32 1, %s1047_s16  ;;  %s48_s25 = sadd.s32 1, %s1039_s14 }
  0x40   : > { %p33_p13 = scmp.ge.s32.totalorder %s32_s19, 2  ;;  %p55_p6 = scmp.ne.s32.totalorder %s1039_s14, %s1035_s13 }
  0x41   : > { %p56_p10 = scmp.eq.s32.totalorder %s1051_s17, 0  ;;  %p823_p3 = scmp.lt.s32.totalorder %s1051_s17, 2 }
  0x42   : > { %s1498_s19 = smov (%p33_p13, %s32_s19), 0  ;;  %p1215_p7 = por %p1117_p2, %p55_p6 }
  0x43   : > { %p57_p5 = por %p56_p10, %p55_p6  ;;  %s43_s28 = ssub.s32 %s1047_s16, %s1498_s19 }
  0x44   : > { %s1485_s27 = scalar_select %p1215_p7, 1, 0 }
  0x45   : > { %s206_s30 = sand.u32 1, %s1039_s14   ;;  %p46_p9 = scmp.eq.s32.totalorder %s43_s28, 0 }
  0x46   : > { %s791_s29 = smul.u32 80, %s206_s30  ;;  %p1222_p11 = pnand %p823_p3, %p57_p5 }
  0x47   : > { %s1227_s5 = scalar_select %p46_p9, %s1039_s14, %s48_s25  }
  0x48   : > { %s792_s6 = smul.u32 1280, %s1047_s16  ;;  %s210_s7 = scalar_lea.vmem [#allocation2], %s791_s29 }
  0x49   : > { %s219_s8 = sshll.u32 %s210_s7, 4  ;;  %s1237_s10 = scalar_lea.sflag [#allocation3], %s206_s30  ;;  %s1235_s8 = int_to_ptr.vmem [resolvable:$true] %s219_s8 }
  0x4a   : > { %s1233_s9 = scalar_lea.hbm %s1471_s0, %s792_s6  ;;  %p937_p12 = pneg %p1222_p11 }
  0x4b   : > { %s935_s28 = scalar_lea.hbm %s1233_s9, 1280  ;;  %s940_s6 = scalar_lea.hbm %s1471_s0, 2560 }
  0x4c   : > { %p936_p2 = scmp.ne.s32.totalorder %s1233_s9, %s935_s28  ;;  %p941_p4 = scmp.lt.u32.totalorder %s1233_s9, %s1471_s0 }
  0x4d   : > { %p942_p13 = scmp.lt.u32.totalorder %s940_s6, %s935_s28  ;;  %p944_p10 = scmp.lt.u32.totalorder %s935_s28, %s1233_s9 }
  0x4e   : > { %p938_p0 = pnand %p937_p12, %p936_p2 }
  0x4f   : > { %p943_p6 = por %p942_p13, %p941_p4 }
  0x50   : > { %p939_p1 = pneg %p938_p0 }
  0x51   : > { %p945_p3 = por %p944_p10, %p943_p6 }
  0x53   : > { %p946_p5 = pnand %p945_p3, %p939_p1 }
  0x55   : > { %949 = shalt.err (!%p946_p5)
}
  0x56   : > { %s950_s30 = scalar_lea.vmem %s1235_s8, 1280  ;;  %s1057_s26 = smov [#allocation2]  }
  0x57   : > { %p951_p9 = scmp.ne.s32.totalorder %s1235_s8, %s950_s30  ;;  %s955_s25 = sshll.u32 %s1057_s26, 4  ;;  %s956_s25 = int_to_ptr.vmem [resolvable:$false] %s955_s25 }
  0x58   : > { %s957_s29 = scalar_lea.vmem %s956_s25, 2560  ;;  %p958_p7 = scmp.lt.s32.totalorder %s1235_s8, %s956_s25 }
  0x59   : > { %p953_p2 = pnand %p951_p9, %p937_p12  ;;  %p959_p4 = scmp.lt.s32.totalorder %s957_s29, %s950_s30 }
  0x5b   : > { %p954_p0 = pneg %p953_p2  ;;  %p960_p13 = por %p959_p4, %p958_p7 }
  0x5d   : > { %p961_p6 = pnand %p960_p13, %p954_p0 }
  0x5f   : > { %964 = shalt.err (!%p961_p6)
}
  0x60   : > { %816 = dma.hbm_to_vmem [thread:$0]  (!%p1222_p11), %s1233_s9, 1280, %s1235_s8, %s1237_s10, %s1055_s11, %s1055_s11, %s1056_s18  }
  0x61   : > { %231 = sbr.rel (%p1133_p8) target bundleno = 199 (0xc7), region = 32  ;;  %s1271_s28 = sand.u32 (!%p1133_p8), 1, %s1035_s13  }
  0x62   : > { %s793_s6 = smul.u32 (!%p1133_p8), 80, %s1271_s28  ;;  %s234_s7 = scalar_lea.sflag (!%p1133_p8), [#allocation3], %s1271_s28 }
  0x63   : > { %p1487_p7 = scmp.ne.s32.totalorder (!%p1133_p8), %s1481_s22, 0 }
  0x64   : > { %s237_s21 = scalar_lea.vmem (!%p1133_p8), [#allocation2], %s793_s6 }
  0x68   : > { %1018 = dma.done.wait (%p1487_p7), %s234_s7, 1280  }
  0x69   : > { %1020 = vsyncadd (%p1487_p7), %s234_s7, 4294966016  ;;  %p1488_p12 = scmp.ne.s32.totalorder %s1479_s20, 0 }
  0x6b   : > { %1022 = dma.done.wait (%p1488_p12), [#allocation6], 10496  }
  0x6c   : > { %1024 = vsyncadd (%p1488_p12), [#allocation6], 4294956800  ;;  %v1283_v0 = vld [vmem:[%s237_s21] sm:$0xff]  ;;  %v1285_v1 = vld [vmem:[%s237_s21 + $0x8] sm:$0xff]  ;;  %vm612_vm0 = vcmask 1040384   ;;  %vm615_vm1 = vcmask 1041408  }
  0x6d   : > { %v1287_v2 = vld [vmem:[%s237_s21 + $0x10] sm:$0xff]  ;;  %v1289_v3 = vld [vmem:[%s237_s21 + $0x18] sm:$0xff]  ;;  %v1291_v4 = vld [vmem:[%s237_s21 + $0x20] sm:$0xff]  ;;  %vm618_vm2 = vcmask 1042432   ;;  %vm621_vm3 = vcmask 1043456   ;;  %vm624_vm4 = vcmask 1044480  }
  0x6e   : > { %v1293_v5 = vld [vmem:[%s237_s21 + $0x28] sm:$0xff]  ;;  %v1295_v6 = vld [vmem:[%s237_s21 + $0x30] sm:$0xff]  ;;  %v1297_v7 = vld [vmem:[%s237_s21 + $0x38] sm:$0xff]  ;;  %s784_s20 = sshll.u32 %s1271_s28, 4  ;;  %vm627_vm5 = vcmask 1045504   ;;  %vm630_vm6 = vcmask 1046528  }
  0x6f   : > { %v1299_v8 = vld [vmem:[%s237_s21 + $0x40] sm:$0xff]  ;;  %v286_v10 = vld [vmem:[#allocation5 + $0x8] sm:$0xff]  ;;  %v288_v13 = vld [vmem:[#allocation5 + $0x18] sm:$0xff]  ;;  %s790_s22 = sshll.u32 %s1043_s15, 8  ;;  %s267_s24 = scalar_lea.vmem [#allocation8], %s784_s20 }
  0x70   : > { %v285_v9 = vld [vmem:[#allocation5] sm:$0xff]  ;;  %v287_v11 = vld [vmem:[#allocation5 + $0x10] sm:$0xff]  ;;  %v1301_v12 = vld [vmem:[%s237_s21 + $0x48] sm:$0xff]  ;;  %v296_v17 = vmul.f32 %v286_v10, %v1285_v1  ;;  %v298_v22 = vmul.f32 %v288_v13, %v1289_v3  ;;  %s656_s11 = sshll.u32 %s267_s24, 4  ;;  %s1422_s8 = scalar_lea.hbm %s1474_s3, %s790_s22  ;;  %s1424_s11 = int_to_ptr.vmem [resolvable:$true] %s656_s11 }
  0x71   : > { %v289_v14 = vld [vmem:[#allocation5 + $0x20] sm:$0xff]  ;;  %v290_v15 = vld [vmem:[#allocation5 + $0x28] sm:$0xff]  ;;  %v295_v16 = vmul.f32 %v285_v9, %v1283_v0  ;;  %v297_v18 = vmul.f32 %v287_v11, %v1287_v2  ;;  %v291_v19 = vld [vmem:[#allocation5 + $0x30] sm:$0xff]  ;;  %s638_s9 = scalar_lea.sflag [#allocation4], %s1271_s28  ;;  %s965_s15 = scalar_lea.vmem %s1424_s11, 256 }
  0x72   : > { %v292_v20 = vld [vmem:[#allocation5 + $0x38] sm:$0xff]  ;;  %v293_v21 = vld [vmem:[#allocation5 + $0x40] sm:$0xff]  ;;  %v299_v23 = vmul.f32 %v289_v14, %v1291_v4  ;;  %v300_v24 = vmul.f32 %v290_v15, %v1293_v5  ;;  %v294_v25 = vld [vmem:[#allocation5 + $0x48] sm:$0xff]  ;;  %v301_v26 = vmul.f32 %v291_v19, %v1295_v6  ;;  %v315_v32 = vadd.f32 %v298_v22, %v296_v17  ;;  %p966_p8 = scmp.ne.s32.totalorder %s1424_s11, %s965_s15  ;;  %p1489_p11 = scmp.ne.s32.totalorder %s1485_s27, 0 }
  0x73   : > { %v302_v27 = vmul.f32 %v292_v20, %v1297_v7  ;;  %v305_v28 = vadd.f32 %v297_v18, %v295_v16  ;;  %v326_v29 = vld [vmem:[#allocation5 + $0x50] sm:$0xff]  ;;  %v327_v30 = vld [vmem:[#allocation5 + $0x58] sm:$0xff]  ;;  %v303_v31 = vmul.f32 %v293_v21, %v1299_v8  ;;  %v328_v33 = vld [vmem:[#allocation5 + $0x60] sm:$0xff]  ;;  %v304_v45 = vmul.f32 %v294_v25, %v1301_v12  ;;  %s1058_s10 = smov [#allocation8]  }
  0x74   : > { %v329_v34 = vld [vmem:[#allocation5 + $0x68] sm:$0xff]  ;;  %v330_v35 = vld [vmem:[#allocation5 + $0x70] sm:$0xff]  ;;  %v336_v36 = vmul.f32 %v326_v29, %v1283_v0  ;;  %v337_v37 = vmul.f32 %v327_v30, %v1285_v1  ;;  %v331_v39 = vld [vmem:[#allocation5 + $0x78] sm:$0xff]  ;;  %v338_v42 = vmul.f32 %v328_v33, %v1287_v2  ;;  %v316_v46 = vadd.f32 %v315_v32, %v300_v24  ;;  %p967_p1 = pnand %p966_p8, %p1489_p11  ;;  %s969_s30 = sshll.u32 %s1058_s10, 4  ;;  %s970_s30 = int_to_ptr.vmem [resolvable:$false] %s969_s30 }
  0x75   : > { %v306_v38 = vadd.f32 %v305_v28, %v299_v23  ;;  %v332_v40 = vld [vmem:[#allocation5 + $0x80] sm:$0xff]  ;;  %v333_v41 = vld [vmem:[#allocation5 + $0x88] sm:$0xff]  ;;  %v339_v43 = vmul.f32 %v329_v34, %v1289_v3  ;;  %v340_v44 = vmul.f32 %v330_v35, %v1291_v4  ;;  %v334_v47 = vld [vmem:[#allocation5 + $0x90] sm:$0xff]  ;;  %v341_v49 = vmul.f32 %v331_v39, %v1293_v5  ;;  %s971_s26 = scalar_lea.vmem %s970_s30, 512  ;;  %p972_p3 = scmp.lt.s32.totalorder %s1424_s11, %s970_s30 }
  0x76   : > { %v335_v48 = vld [vmem:[#allocation5 + $0x98] sm:$0xff]  ;;  %v342_v50 = vmul.f32 %v332_v40, %v1295_v6  ;;  %v367_v51 = vld [vmem:[#allocation5 + $0xa0] sm:$0xff]  ;;  %v343_v53 = vmul.f32 %v333_v41, %v1297_v7  ;;  %v344_v54 = vmul.f32 %v334_v47, %v1299_v8  ;;  %v346_v55 = vadd.f32 %v338_v42, %v336_v36  ;;  %v368_v56 = vld [vmem:[#allocation5 + $0xa8] sm:$0xff]  ;;  %p968_p10 = pneg %p967_p1  ;;  %p973_p5 = scmp.lt.s32.totalorder %s971_s26, %s965_s15 }
  0x77   : > { %v307_v52 = vadd.f32 %v306_v38, %v301_v26  ;;  %v369_v57 = vld [vmem:[#allocation5 + $0xb0] sm:$0xff]  ;;  %v370_v58 = vld [vmem:[#allocation5 + $0xb8] sm:$0xff]  ;;  %v317_v59 = vadd.f32 %v316_v46, %v302_v27  ;;  %v356_v60 = vadd.f32 %v339_v43, %v337_v37  ;;  %v371_v61 = vld [vmem:[#allocation5 + $0xc0] sm:$0xff]  ;;  %v377_v63 = vmul.f32 %v367_v51, %v1283_v0 }
  0x78   : > { %v372_v62 = vld [vmem:[#allocation5 + $0xc8] sm:$0xff]  ;;  %v378_v9 = vmul.f32 %v368_v56, %v1285_v1  ;;  %v347_v11 = vadd.f32 %v346_v55, %v340_v44  ;;  %v373_v13 = vld [vmem:[#allocation5 + $0xd0] sm:$0xff]  ;;  %v374_v14 = vld [vmem:[#allocation5 + $0xd8] sm:$0xff]  ;;  %v379_v15 = vmul.f32 %v369_v57, %v1287_v2  ;;  %v380_v16 = vmul.f32 %v370_v58, %v1289_v3  ;;  %p974_p9 = por %p973_p5, %p972_p3 }
  0x79   : > { %v308_v10 = vadd.f32 %v307_v52, %v303_v31  ;;  %v318_v17 = vadd.f32 %v317_v59, %v304_v45  ;;  %v345_v18 = vmul.f32 %v335_v48, %v1301_v12  ;;  %v357_v19 = vadd.f32 %v356_v60, %v341_v49  ;;  %v375_v22 = vld [vmem:[#allocation5 + $0xe0] sm:$0xff]  ;;  %v376_v23 = vld [vmem:[#allocation5 + $0xe8] sm:$0xff]  ;;  %v408_v44 = vld [vmem:[#allocation5 + $0xf0] sm:$0xff] }
  0x7a   : > { %v348_v21 = vadd.f32 %v347_v11, %v342_v50  ;;  %v381_v24 = vmul.f32 %v371_v61, %v1291_v4  ;;  %v382_v25 = vmul.f32 %v372_v62, %v1293_v5  ;;  %v383_v28 = vmul.f32 %v373_v13, %v1295_v6  ;;  %v410_v45 = vld [vmem:[#allocation5 + $0x100] sm:$0xff]  ;;  %v409_v49 = vld [vmem:[#allocation5 + $0xf8] sm:$0xff]  ;;  %v411_v50 = vld [vmem:[#allocation5 + $0x108] sm:$0xff]  ;;  %p975_p2 = pnand %p974_p9, %p968_p10 }
  0x7b   : > { %v309_v20 = vrot.slane %v308_v10, 4  ;;  %v319_v26 = vrot.slane %v318_v17, 4  ;;  %v358_v27 = vadd.f32 %v357_v19, %v343_v53  ;;  %v384_v29 = vmul.f32 %v374_v14, %v1297_v7  ;;  %v413_v57 = vld [vmem:[#allocation5 + $0x118] sm:$0xff]  ;;  %v414_v62 = vld [vmem:[#allocation5 + $0x120] sm:$0xff]  ;;  %v416_v14 = vld [vmem:[#allocation5 + $0x130] sm:$0xff] }
  0x7c   : > { %v349_v31 = vadd.f32 %v348_v21, %v344_v54  ;;  %v387_v32 = vadd.f32 %v379_v15, %v377_v63  ;;  %v397_v33 = vadd.f32 %v380_v16, %v378_v9  ;;  %v385_v36 = vmul.f32 %v375_v22, %v1299_v8  ;;  %v412_v54 = vld [vmem:[#allocation5 + $0x110] sm:$0xff]  ;;  %v415_v63 = vld [vmem:[#allocation5 + $0x128] sm:$0xff] }
  0x7d   : > { %v310_v30 = vadd.f32 %v309_v20, %v308_v10  ;;  %v320_v34 = vadd.f32 %v319_v26, %v318_v17  ;;  %v359_v35 = vadd.f32 %v358_v27, %v345_v18  ;;  %v386_v37 = vmul.f32 %v376_v23, %v1301_v12  ;;  %v417_v18 = vld [vmem:[#allocation5 + $0x138] sm:$0xff]  ;;  %v449_v20 = vld [vmem:[#allocation5 + $0x140] sm:$0xff]  ;;  %v451_v26 = vld [vmem:[#allocation5 + $0x150] sm:$0xff] }
  0x7e   : > { %v350_v39 = vrot.slane %v349_v31, 4  ;;  %v388_v40 = vadd.f32 %v387_v32, %v381_v24  ;;  %v398_v41 = vadd.f32 %v397_v33, %v382_v25  ;;  %v418_v58 = vmul.f32 %v408_v44, %v1283_v0  ;;  %v450_v25 = vld [vmem:[#allocation5 + $0x148] sm:$0xff]  ;;  %v452_v27 = vld [vmem:[#allocation5 + $0x158] sm:$0xff] }
  0x7f   : > { %v311_v38 = vrot.slane %v310_v30, 2  ;;  %v321_v42 = vrot.slane %v320_v34, 2  ;;  %v360_v43 = vrot.slane %v359_v35, 4  ;;  %v420_v59 = vmul.f32 %v410_v45, %v1287_v2 }
  0x80   : > { %v351_v46 = vadd.f32 %v350_v39, %v349_v31  ;;  %v389_v47 = vadd.f32 %v388_v40, %v383_v28  ;;  %v399_v48 = vadd.f32 %v398_v41, %v384_v29  ;;  %v419_v9 = vmul.f32 %v409_v49, %v1285_v1  ;;  %v455_v39 = vld [vmem:[#allocation5 + $0x170] sm:$0xff] }
  0x81   : > { %v312_v51 = vadd.f32 %v311_v38, %v310_v30  ;;  %v322_v52 = vadd.f32 %v321_v42, %v320_v34  ;;  %v361_v53 = vadd.f32 %v360_v43, %v359_v35  ;;  %v421_v10 = vmul.f32 %v411_v50, %v1289_v3  ;;  %v453_v35 = vld [vmem:[#allocation5 + $0x160] sm:$0xff] }
  0x82   : > { %v390_v55 = vadd.f32 %v389_v47, %v385_v36  ;;  %v400_v56 = vadd.f32 %v399_v48, %v386_v37  ;;  %v352_v60 = vrot.slane %v351_v46, 2  ;;  %v422_v15 = vmul.f32 %v412_v54, %v1291_v4  ;;  %v454_v36 = vld [vmem:[#allocation5 + $0x168] sm:$0xff]  ;;  %v456_v47 = vld [vmem:[#allocation5 + $0x178] sm:$0xff]  ;;  %v457_v50 = vld [vmem:[#allocation5 + $0x180] sm:$0xff] }
  0x83   : > { %v362_v61 = vrot.slane %v361_v53, 2  ;;  %v313_v16 = vrot.slane %v312_v51, 1  ;;  %v323_v17 = vrot.slane %v322_v52, 1  ;;  %v423_v19 = vmul.f32 %v413_v57, %v1293_v5 }
  0x84   : > { %v391_v11 = vrot.slane %v390_v55, 4  ;;  %v401_v13 = vrot.slane %v400_v56, 4  ;;  %v424_v22 = vmul.f32 %v414_v62, %v1295_v6  ;;  %v425_v23 = vmul.f32 %v415_v63, %v1297_v7  ;;  %v491_v63 = vld [vmem:[#allocation5 + $0x198] sm:$0xff] }
  0x85   : > { %v428_v24 = vadd.f32 %v420_v59, %v418_v58  ;;  %v353_v28 = vadd.f32 %v352_v60, %v351_v46  ;;  %v363_v29 = vadd.f32 %v362_v61, %v361_v53  ;;  %v426_v30 = vmul.f32 %v416_v14, %v1299_v8  ;;  %v458_v53 = vld [vmem:[#allocation5 + $0x188] sm:$0xff] }
  0x86   : > { %v392_v21 = vadd.f32 %v391_v11, %v390_v55  ;;  %v438_v31 = vadd.f32 %v421_v10, %v419_v9  ;;  %v402_v32 = vadd.f32 %v401_v13, %v400_v56  ;;  %v427_v33 = vmul.f32 %v417_v18, %v1301_v12  ;;  %v492_v9 = vld [vmem:[#allocation5 + $0x1a0] sm:$0xff]  ;;  %v493_v10 = vld [vmem:[#allocation5 + $0x1a8] sm:$0xff] }
  0x87   : > { %v429_v34 = vadd.f32 %v428_v24, %v422_v15  ;;  %v459_v37 = vmul.f32 %v449_v20, %v1283_v0  ;;  %v460_v40 = vmul.f32 %v450_v25, %v1285_v1  ;;  %v461_v41 = vmul.f32 %v451_v26, %v1287_v2  ;;  %v495_v20 = vld [vmem:[#allocation5 + $0x1b8] sm:$0xff] }
  0x88   : > { %v439_v38 = vadd.f32 %v438_v31, %v423_v19  ;;  %v462_v42 = vmul.f32 %v452_v27, %v1289_v3  ;;  %v1347_v43 = vadd.f32 %v313_v16, %v312_v51  ;;  %v1349_v44 = vadd.f32 %v323_v17, %v322_v52  ;;  %v490_v51 = vld [vmem:[#allocation5 + $0x190] sm:$0xff] }
  0x89   : > { %v393_v45 = vrot.slane %v392_v21, 2  ;;  %v430_v46 = vadd.f32 %v429_v34, %v424_v22  ;;  %v354_v48 = vrot.slane %v353_v28, 1  ;;  %v463_v54 = vmul.f32 %v453_v35, %v1291_v4  ;;  %v494_v19 = vld [vmem:[#allocation5 + $0x1b0] sm:$0xff]  ;;  %v497_v34 = vld [vmem:[#allocation5 + $0x1c8] sm:$0xff] }
  0x8a   : > { %v440_v49 = vadd.f32 %v439_v38, %v425_v23  ;;  %v464_v55 = vmul.f32 %v454_v36, %v1293_v5  ;;  %v364_v56 = vrot.slane %v363_v29, 1  ;;  %v403_v57 = vrot.slane %v402_v32, 2 }
  0x8b   : > { %v431_v58 = vadd.f32 %v430_v46, %v426_v30  ;;  %v465_v59 = vmul.f32 %v455_v39, %v1295_v6  ;;  %v466_v52 = vmul.f32 %v456_v47, %v1297_v7  ;;  %v469_v61 = vadd.f32 %v461_v41, %v459_v37  ;;  %v499_v46 = vld [vmem:[#allocation5 + $0x1d8] sm:$0xff] }
  0x8c   : > { %v441_v60 = vadd.f32 %v440_v49, %v427_v33  ;;  %v479_v62 = vadd.f32 %v462_v42, %v460_v40  ;;  %v394_v11 = vadd.f32 %v393_v45, %v392_v21  ;;  %v467_v14 = vmul.f32 %v457_v50, %v1299_v8  ;;  %v496_v33 = vld [vmem:[#allocation5 + $0x1c0] sm:$0xff]  ;;  %v498_v45 = vld [vmem:[#allocation5 + $0x1d0] sm:$0xff] }
  0x8d   : > { %v432_v13 = vrot.slane %v431_v58, 4  ;;  %v468_v15 = vmul.f32 %v458_v53, %v1301_v12  ;;  %v470_v17 = vadd.f32 %v469_v61, %v463_v54  ;;  %v500_v22 = vmul.f32 %v490_v51, %v1283_v0 }
  0x8e   : > { %v442_v16 = vrot.slane %v441_v60, 4  ;;  %v480_v18 = vadd.f32 %v479_v62, %v464_v55  ;;  %v501_v24 = vmul.f32 %v491_v63, %v1285_v1  ;;  %v502_v25 = vmul.f32 %v492_v9, %v1287_v2  ;;  %v535_v62 = vld [vmem:[#allocation5 + $0x200] sm:$0xff]  ;;  %v536_v63 = vld [vmem:[#allocation5 + $0x208] sm:$0xff] }
  0x8f   : > { %v433_v23 = vadd.f32 %v432_v13, %v431_v58  ;;  %v503_v26 = vmul.f32 %v493_v10, %v1289_v3  ;;  %v404_v21 = vadd.f32 %v403_v57, %v402_v32  ;;  %v471_v30 = vadd.f32 %v470_v17, %v465_v59  ;;  %v534_v57 = vld [vmem:[#allocation5 + $0x1f8] sm:$0xff] }
  0x90   : > { %v443_v27 = vadd.f32 %v442_v16, %v441_v60  ;;  %v481_v31 = vadd.f32 %v480_v18, %v466_v52  ;;  %v1361_v35 = vadd.f32 %v354_v48, %v353_v28  ;;  %v1363_v36 = vadd.f32 %v364_v56, %v363_v29  ;;  %v531_v28 = vld [vmem:[#allocation5 + $0x1e0] sm:$0xff]  ;;  %v532_v48 = vld [vmem:[#allocation5 + $0x1e8] sm:$0xff]  ;;  %v533_v56 = vld [vmem:[#allocation5 + $0x1f0] sm:$0xff] }
  0x91   : > { %v504_v37 = vmul.f32 %v494_v19, %v1291_v4  ;;  %v505_v38 = vmul.f32 %v495_v20, %v1293_v5  ;;  %v434_v39 = vrot.slane %v433_v23, 2  ;;  %v472_v41 = vadd.f32 %v471_v30, %v467_v14  ;;  %v538_v16 = vld [vmem:[#allocation5 + $0x218] sm:$0xff] }
  0x92   : > { %v444_v40 = vrot.slane %v443_v27, 2  ;;  %v482_v42 = vadd.f32 %v481_v31, %v468_v15  ;;  %v506_v32 = vmul.f32 %v496_v33, %v1295_v6  ;;  %v507_v47 = vmul.f32 %v497_v34, %v1297_v7  ;;  %v537_v15 = vld [vmem:[#allocation5 + $0x210] sm:$0xff] }
  0x93   : > { %v510_v49 = vadd.f32 %v502_v25, %v500_v22  ;;  %v520_v50 = vadd.f32 %v503_v26, %v501_v24  ;;  %v395_v29 = vrot.slane %v394_v11, 1  ;;  %v405_v53 = vrot.slane %v404_v21, 1  ;;  %v539_v26 = vld [vmem:[#allocation5 + $0x220] sm:$0xff] }
  0x94   : > { %v473_v54 = vrot.slane %v472_v41, 4  ;;  %v483_v55 = vrot.slane %v482_v42, 4  ;;  %v508_v58 = vmul.f32 %v498_v45, %v1299_v8  ;;  %v509_v59 = vmul.f32 %v499_v46, %v1301_v12  ;;  %v574_v45 = vld [vmem:[#allocation5 + $0x240] sm:$0xff]  ;;  %v575_v46 = vld [vmem:[#allocation5 + $0x248] sm:$0xff] }
  0x95   : > { %v511_v51 = vadd.f32 %v510_v49, %v504_v37  ;;  %v521_v60 = vadd.f32 %v520_v50, %v505_v38  ;;  %v1371_v52 = vadd.f32 %v434_v39, %v433_v23  ;;  %v1373_v61 = vadd.f32 %v444_v40, %v443_v27  ;;  %v540_v27 = vld [vmem:[#allocation5 + $0x228] sm:$0xff]  ;;  %v572_v37 = vld [vmem:[#allocation5 + $0x230] sm:$0xff] }
  0x96   : > { %v541_v9 = vmul.f32 %v531_v28, %v1283_v0  ;;  %v542_v10 = vmul.f32 %v532_v48, %v1285_v1  ;;  %v543_v17 = vmul.f32 %v533_v56, %v1287_v2  ;;  %v544_v18 = vmul.f32 %v534_v57, %v1289_v3  ;;  %v578_v56 = vld [vmem:[#allocation5 + $0x260] sm:$0xff]  ;;  %v579_v57 = vld [vmem:[#allocation5 + $0x268] sm:$0xff] }
  0x97   : > { %v512_v13 = vadd.f32 %v511_v51, %v506_v32  ;;  %v522_v14 = vadd.f32 %v521_v60, %v507_v47  ;;  %v1379_v19 = vadd.f32 %v395_v29, %v394_v11  ;;  %v1381_v20 = vadd.f32 %v405_v53, %v404_v21 }
  0x98   : > { %v474_v22 = vadd.f32 %v473_v54, %v472_v41  ;;  %v484_v23 = vadd.f32 %v483_v55, %v482_v42  ;;  %v545_v30 = vmul.f32 %v535_v62, %v1291_v4  ;;  %v546_v31 = vmul.f32 %v536_v63, %v1293_v5  ;;  %v573_v42 = vld [vmem:[#allocation5 + $0x238] sm:$0xff]  ;;  %v576_v54 = vld [vmem:[#allocation5 + $0x250] sm:$0xff] }
  0x99   : > { %v513_v24 = vadd.f32 %v512_v13, %v508_v58  ;;  %v523_v25 = vadd.f32 %v522_v14, %v509_v59  ;;  %v436_v33 = vrot.slane %v1371_v52, 1  ;;  %v446_v34 = vrot.slane %v1373_v61, 1  ;;  %v577_v55 = vld [vmem:[#allocation5 + $0x258] sm:$0xff] }
  0x9a   : > { %v547_v11 = vmul.f32 %v537_v15, %v1295_v6  ;;  %v548_v21 = vmul.f32 %v538_v16, %v1297_v7  ;;  %v551_v40 = vadd.f32 %v543_v17, %v541_v9  ;;  %v561_v41 = vadd.f32 %v544_v18, %v542_v10  ;;  %v580_v15 = vld [vmem:[#allocation5 + $0x270] sm:$0xff]  ;;  %v581_v16 = vld [vmem:[#allocation5 + $0x278] sm:$0xff] }
  0x9b   : > { %v514_v38 = vrot.slane %v513_v24, 4  ;;  %v524_v39 = vrot.slane %v523_v25, 4  ;;  %v475_v32 = vrot.slane %v474_v22, 2  ;;  %v485_v47 = vrot.slane %v484_v23, 2 }
  0x9c   : > { %v549_v49 = vmul.f32 %v539_v26, %v1299_v8  ;;  %v550_v50 = vmul.f32 %v540_v27, %v1301_v12  ;;  %v552_v29 = vadd.f32 %v551_v40, %v545_v30  ;;  %v562_v53 = vadd.f32 %v561_v41, %v546_v31 }
  0x9d   : > { %v515_v28 = vadd.f32 %v514_v38, %v513_v24  ;;  %v525_v48 = vadd.f32 %v524_v39, %v523_v25  ;;  %v582_v58 = vmul.f32 %v572_v37, %v1283_v0  ;;  %v583_v59 = vmul.f32 %v573_v42, %v1285_v1 }
  0x9e   : > { %v584_v51 = vmul.f32 %v574_v45, %v1287_v2  ;;  %v585_v60 = vmul.f32 %v575_v46, %v1289_v3  ;;  %v553_v9 = vadd.f32 %v552_v29, %v547_v11  ;;  %v563_v10 = vadd.f32 %v562_v53, %v548_v21 }
  0x9f   : > { %v516_v62 = vrot.slane %v515_v28, 2  ;;  %v526_v63 = vrot.slane %v525_v48, 2  ;;  %v476_v13 = vadd.f32 %v475_v32, %v474_v22  ;;  %v486_v14 = vadd.f32 %v485_v47, %v484_v23 }
  0xa0   : > { %v586_v17 = vmul.f32 %v576_v54, %v1291_v4  ;;  %v587_v18 = vmul.f32 %v577_v55, %v1293_v5  ;;  %v554_v0 = vadd.f32 %v553_v9, %v549_v49  ;;  %v564_v24 = vadd.f32 %v563_v10, %v550_v50 }
  0xa1   : > { %v588_v1 = vmul.f32 %v578_v56, %v1295_v6  ;;  %v589_v2 = vmul.f32 %v579_v57, %v1297_v7  ;;  %v517_v3 = vadd.f32 %v516_v62, %v515_v28  ;;  %v527_v25 = vadd.f32 %v526_v63, %v525_v48 }
  0xa2   : > { %v592_v26 = vadd.f32 %v584_v51, %v582_v58  ;;  %v602_v27 = vadd.f32 %v585_v60, %v583_v59  ;;  %v555_v30 = vrot.slane %v554_v0, 4  ;;  %v565_v22 = vrot.slane %v564_v24, 4 }
  0xa3   : > { %v590_v23 = vmul.f32 %v580_v15, %v1299_v8  ;;  %v591_v31 = vmul.f32 %v581_v16, %v1301_v12  ;;  %v613_v5 = vsel %vm612_vm0, %v1347_v43, %v1361_v35  ;;  %v614_v6 = vsel %vm612_vm0, %v1349_v44, %v1363_v36  ;;  %v273_v15 = vld [vmem:[#allocation7] sm:$0xff]  ;;  %v274_v16 = vld [vmem:[#allocation7 + $0x8] sm:$0xff] }
  0xa4   : > { %v593_v4 = vadd.f32 %v592_v26, %v586_v17  ;;  %v603_v11 = vadd.f32 %v602_v27, %v587_v18  ;;  %v477_v7 = vrot.slane %v476_v13, 1  ;;  %v487_v21 = vrot.slane %v486_v14, 1 }
  0xa5   : > { %v556_v37 = vadd.f32 %v555_v30, %v554_v0  ;;  %v566_v38 = vadd.f32 %v565_v22, %v564_v24  ;;  %v437_v39 = vadd.f32 %v436_v33, %v1371_v52  ;;  %v447_v8 = vadd.f32 %v446_v34, %v1373_v61 }
  0xa6   : > { %v594_v40 = vadd.f32 %v593_v4, %v588_v1  ;;  %v604_v12 = vadd.f32 %v603_v11, %v589_v2  ;;  %v616_v45 = vsel %vm615_vm1, %v613_v5, %v1379_v19  ;;  %v617_v43 = vsel %vm615_vm1, %v614_v6, %v1381_v20 }
  0xa7   : > { %v557_v41 = vrot.slane %v556_v37, 2  ;;  %v567_v42 = vrot.slane %v566_v38, 2  ;;  %v518_v35 = vrot.slane %v517_v3, 1  ;;  %v528_v44 = vrot.slane %v527_v25, 1 }
  0xa8   : > { %v595_v36 = vadd.f32 %v594_v40, %v590_v23  ;;  %v605_v46 = vadd.f32 %v604_v12, %v591_v31  ;;  %v478_v32 = vadd.f32 %v477_v7, %v476_v13  ;;  %v488_v47 = vadd.f32 %v487_v21, %v486_v14 }
  0xa9   : > { %v558_v52 = vadd.f32 %v557_v41, %v556_v37  ;;  %v568_v33 = vadd.f32 %v567_v42, %v566_v38  ;;  %v619_v49 = vsel %vm618_vm2, %v616_v45, %v437_v39  ;;  %v620_v50 = vsel %vm618_vm2, %v617_v43, %v447_v8 }
  0xaa   : > { %v596_v61 = vrot.slane %v595_v36, 4  ;;  %v606_v34 = vrot.slane %v605_v46, 4  ;;  %v519_v48 = vadd.f32 %v518_v35, %v517_v3  ;;  %v529_v29 = vadd.f32 %v528_v44, %v527_v25 }
  0xab   : > { %v559_v28 = vrot.slane %v558_v52, 1  ;;  %v569_v19 = vrot.slane %v568_v33, 1  ;;  %v622_v54 = vsel %vm621_vm3, %v619_v49, %v478_v32  ;;  %v623_v55 = vsel %vm621_vm3, %v620_v50, %v488_v47 }
  0xac   : > { %v597_v20 = vadd.f32 %v596_v61, %v595_v36  ;;  %v607_v53 = vadd.f32 %v606_v34, %v605_v46  ;;  %v625_v62 = vsel %vm624_vm4, %v622_v54, %v519_v48  ;;  %v626_v63 = vsel %vm624_vm4, %v623_v55, %v529_v29 }
  0xad   : > { %v560_v58 = vadd.f32 %v559_v28, %v558_v52  ;;  %v570_v59 = vadd.f32 %v569_v19, %v568_v33 }
  0xae   : > { %v598_v56 = vrot.slane %v597_v20, 2  ;;  %v608_v57 = vrot.slane %v607_v53, 2 }
  0xaf   : > { %v628_v13 = vsel %vm627_vm5, %v625_v62, %v560_v58  ;;  %v629_v14 = vsel %vm627_vm5, %v626_v63, %v570_v59 }
  0xb0   : > { %v599_v51 = vadd.f32 %v598_v56, %v597_v20  ;;  %v609_v60 = vadd.f32 %v608_v57, %v607_v53 }
  0xb2   : > { %v600_v9 = vrot.slane %v599_v51, 1  ;;  %v610_v10 = vrot.slane %v609_v60, 1 }
  0xb4   : > { %v601_v17 = vadd.f32 %v600_v9, %v599_v51  ;;  %v611_v18 = vadd.f32 %v610_v10, %v609_v60 }
  0xb6   : > { %v631_v0 = vsel %vm630_vm6, %v628_v13, %v601_v17  ;;  %v632_v24 = vsel %vm630_vm6, %v629_v14, %v611_v18 }
  0xb7   : > { %v633_v1 = vadd.f32 %v631_v0, %v273_v15  ;;  %v634_v2 = vadd.f32 %v632_v24, %v274_v16 }
  0xb9   : > { %635 = vst [vmem:[%s267_s24] sm:$0xff] %v633_v1  ;;  %636 = vst [vmem:[%s267_s24 + $0x8] sm:$0xff] %v634_v2 }
  0xba   : > { %978 = shalt.err (!%p975_p2)
}
  0xbb   : > { %s979_s25 = scalar_lea.hbm %s1422_s8, 256  ;;  %s983_s6 = scalar_lea.hbm %s1474_s3, 512 }
  0xbc   : > { %p980_p0 = scmp.ne.s32.totalorder %s1422_s8, %s979_s25  ;;  %p984_p6 = scmp.lt.u32.totalorder %s1422_s8, %s1474_s3 }
  0xbd   : > { %p985_p7 = scmp.lt.u32.totalorder %s983_s6, %s979_s25  ;;  %p987_p8 = scmp.lt.u32.totalorder %s979_s25, %s1422_s8 }
  0xbe   : > { %p981_p4 = pnand %p980_p0, %p1489_p11 }
  0xbf   : > { %p986_p12 = por %p985_p7, %p984_p6 }
  0xc0   : > { %p982_p13 = pneg %p981_p4 }
  0xc1   : > { %p988_p1 = por %p987_p8, %p986_p12 }
  0xc3   : > { %p989_p10 = pnand %p988_p1, %p982_p13 }
  0xc5   : > { %992 = shalt.err (!%p989_p10)
}
  0xc6   : > { %804 = dma.vmem_to_hbm [thread:$0]  (%p1489_p11), %s1424_s11, 256, %s1422_s8, %s638_s9  }
  0xc7 PF: > { %s668_s20 = sand.u32 1, %s1031_s12   ;;  %p1490_p3 = scmp.ne.s32.totalorder %s1482_s23, 0 }
  0xc8   : > { %p1491_p5 = scmp.ge.s32.totalorder %s1051_s17, 2  ;;  %s669_s22 = scalar_lea.sflag [#allocation4], %s668_s20 }
  0xca   : > { %p818_p9 = pnand %p1491_p5, %p1490_p3 }
  0xcc   : > { %1026 = dma.done.wait (!%p818_p9), %s669_s22, 256  }
  0xcd   : > { %1028 = vsyncadd (!%p818_p9), %s669_s22, 4294967040  ;;  %s20_s17 = sadd.s32 1, %s1051_s17   ;;  %s1492_s12 = smov %s1035_s13 }
  0xce   : > { %p17_p2 = scmp.ge.s32.totalorder %s20_s17, 4   ;;  %s1493_s13 = smov %s1039_s14 }
  0xcf   : > { %s1494_s14 = smov %s1227_s5  ;;  %s1495_s15 = smov %s1047_s16 }
  0xd0   : > { %s1496_s16 = smov %s1498_s19  ;;  %19 = sbr.rel (!%p17_p2) target bundleno = 7 (0x7), region = 94 }
  0xd7   :  { %674 = vsyncpa [#allocation3], 1 }
  0xd8   :  { %676 = vsyncpa [#allocation3 + $0x1], 1 }
  0xd9   :  { %677 = vsyncpa [#allocation6], 1 }
  0xda   :  { %678 = vsyncpa [#allocation4], 1 }
  0xdb   :  { %680 = vsyncpa [#allocation4 + $0x1], 1 }

</bundles_post_ra>
